<compile_context>
chip_gen: v6e
topology: v6e:2x2x1
jax: 0.10.0
libtpu: 0.0.40
codegen_flags: <defaults>
</compile_context>

<pallas_src>
import functools

import numpy as np

import jax
import jax.numpy as jnp
from jax.experimental import pallas as pl
from jax.experimental.pallas import tpu as pltpu


# ---------------------------------------------------------------------------
# Fused kernel: out[i] += adj[i, cols[i, s]] @ (x[cols[i, s]] @ W)
# ---------------------------------------------------------------------------
def _fused_gcn_kernel(cols_ref, counts_ref, adj_ref, x_ref, w_ref, o_ref):
    i = pl.program_id(0)  # output / adjacency row block
    s = pl.program_id(1)  # position in this row block's compacted column list

    @pl.when(s == 0)
    def _init():
        o_ref[...] = jnp.zeros_like(o_ref)

    # Skip padded entries (they repeat the last real block index, so Pallas does
    # not re-DMA them, and this guard prevents double accumulation).
    @pl.when(s < counts_ref[i])
    def _accum():
        # support block (tk, F_out): formed on the fly; W is VMEM-resident.
        support = jnp.dot(
            x_ref[...], w_ref[...], preferred_element_type=jnp.float32
        ).astype(jnp.bfloat16)
        # Accumulate directly into the resident f32 output tile (no scratch).
        o_ref[...] += jnp.dot(
            adj_ref[...], support, preferred_element_type=jnp.float32
        )


# ---------------------------------------------------------------------------
# Tile selection
# ---------------------------------------------------------------------------
def _pick_tm(n):
    # Row block of the output/adjacency. Prefer large tiles, but keep >= 2 row
    # blocks so v7x's two TensorCores both get work on the "parallel" axis.
    for t in (512, 384, 256, 128, 64, 32, 16, 8):
        if n % t == 0 and n // t >= 2:
            return t
    return n  # full extent (always layout-legal)


def _pick_tk(n):
    # Node-contraction block. Prefer multiples of 256 to keep the 2x256 MXU fed.
    for t in (512, 256, 128):
        if n % t == 0:
            return t
    return n  # full extent


# ---------------------------------------------------------------------------
# Host-side block-sparsity structure (compacted nonzero column-block lists).
# ---------------------------------------------------------------------------
def _block_structure(adj_np, tm, tk):
    n = adj_np.shape[0]
    mb, kb = n // tm, n // tk
    nz = adj_np.reshape(mb, tm, kb, tk).any(axis=(1, 3))  # (mb, kb) bool
    counts = nz.sum(axis=1).astype(np.int32)
    smax = max(int(counts.max()), 1)
    cols = np.zeros((mb, smax), dtype=np.int32)
    for i in range(mb):
        idx = np.flatnonzero(nz[i]).astype(np.int32)
        if idx.size > 0:
            cols[i, : idx.size] = idx
            cols[i, idx.size:] = idx[-1]  # repeat last -> no extra DMA; guarded
    return jnp.asarray(cols), jnp.asarray(counts)


# ---------------------------------------------------------------------------
# pallas_call wrapper (jitted; tiles static)
# ---------------------------------------------------------------------------
@functools.partial(jax.jit, static_argnames=("tm", "tk"))
def _gcn_pallas(cols, counts, adj, x, weight, *, tm, tk):
    n, f_in = x.shape
    f_out = weight.shape[1]
    mb = n // tm
    smax = cols.shape[1]

    adj_b = adj.astype(jnp.bfloat16)
    x_b = x.astype(jnp.bfloat16)
    w_b = weight.astype(jnp.bfloat16)

    # Dense upper-bound advisory cost (support is recomputed once per row block).
    cost = pl.CostEstimate(
        flops=2 * n * f_in * f_out * mb + 2 * n * n * f_out,
        transcendentals=0,
        bytes_accessed=(n * n + mb * n * f_in + f_in * f_out) * 2 + n * f_out * 4,
    )

    return pl.pallas_call(
        _fused_gcn_kernel,
        out_shape=jax.ShapeDtypeStruct((n, f_out), jnp.float32),
        grid_spec=pltpu.PrefetchScalarGridSpec(
            num_scalar_prefetch=2,
            grid=(mb, smax),
            in_specs=[
                # adjacency block (tm, tk): column block chosen by compacted list
                pl.BlockSpec((tm, tk), lambda i, s, cols, counts: (i, cols[i, s])),
                # matching feature block (tk, F_in)
                pl.BlockSpec((tk, f_in), lambda i, s, cols, counts: (cols[i, s], 0)),
                # full weight, VMEM-resident for the whole kernel
                pl.BlockSpec((f_in, f_out), lambda i, s, cols, counts: (0, 0)),
            ],
            out_specs=pl.BlockSpec((tm, f_out), lambda i, s, cols, counts: (i, 0)),
        ),
        compiler_params=pltpu.CompilerParams(
            dimension_semantics=("parallel", "arbitrary"),
            vmem_limit_bytes=32 * 1024 * 1024,  # plenty for these tiles, safe on v7x
        ),
        cost_estimate=cost,
    )(cols, counts, adj_b, x_b, w_b)


# ---------------------------------------------------------------------------
# GCNConv forward: output = adj @ (input @ weight)
# ---------------------------------------------------------------------------
def gcn_conv_forward(x, adj, weight):
    n, f_in = x.shape
    assert adj.shape == (n, n)
    assert weight.shape[0] == f_in

    tm = _pick_tm(n)
    tk = _pick_tk(n)
    assert n % tm == 0 and n % tk == 0, "N must be divisible by the chosen tiles"

    # Host-side block-sparsity preprocessing (static graph -> done once).
    adj_np = np.asarray(jax.device_get(adj))
    cols, counts = _block_structure(adj_np, tm, tk)

    return _gcn_pallas(cols, counts, adj, x, weight, tm=tm, tk=tk)


def xavier_uniform(key, fan_in, fan_out, dtype=jnp.float32):
    # Matches torch.nn.init.xavier_uniform_ (gain=1.0).
    bound = (6.0 / (fan_in + fan_out)) ** 0.5
    return jax.random.uniform(
        key, (fan_in, fan_out), dtype=dtype, minval=-bound, maxval=bound
    )


if __name__ == "__main__":
    # Small, TPU-tile-friendly shapes consistent with GCNConv(in_features, out_features).
    N_NODES = 256
    F_IN = 128
    F_OUT = 128

    key = jax.random.PRNGKey(0)
    k_x, k_adj, k_w = jax.random.split(key, 3)

    # Node features.
    x = jax.random.normal(k_x, (N_NODES, F_IN), dtype=jnp.float32)

    # Dense, row-normalized random adjacency (stand-in for the sparse normalized adj).
    adj_raw = (jax.random.uniform(k_adj, (N_NODES, N_NODES)) < 0.05).astype(jnp.float32)
    adj_raw = adj_raw + jnp.eye(N_NODES, dtype=jnp.float32)  # self-loops
    deg = jnp.sum(adj_raw, axis=1, keepdims=True)
    adj = adj_raw / deg

    # Deterministic Xavier-uniform weight init (as in reset_parameters()).
    weight = xavier_uniform(k_w, F_IN, F_OUT)

    out = gcn_conv_forward(x, adj, weight)
    out = jax.block_until_ready(out)
    assert out.shape == (N_NODES, F_OUT)

    # Reference mirroring the kernel math (bf16 operands, f32 accumulation).
    xb = x.astype(jnp.bfloat16).astype(jnp.float32)
    ab = adj.astype(jnp.bfloat16).astype(jnp.float32)
    wb = weight.astype(jnp.bfloat16).astype(jnp.float32)
    support_ref = (xb @ wb).astype(jnp.bfloat16).astype(jnp.float32)
    ref_bf16 = ab @ support_ref
    assert jnp.allclose(out, ref_bf16, atol=2e-2, rtol=2e-2), float(
        jnp.max(jnp.abs(out - ref_bf16))
    )

    # Sanity check against the full-f32 PyTorch-equivalent math (bf16 tolerance).
    ref_f32 = adj @ (x @ weight)
    assert jnp.allclose(out, ref_f32, atol=7e-2, rtol=7e-2), float(
        jnp.max(jnp.abs(out - ref_f32))
    )

    print("KERNEL_OK")
</pallas_src>

<mosaic_0001>
module attributes {stable_mosaic.version = 11 : i64} {
  func.func @_fused_gcn_kernel(%arg0: i32, %arg1: i32, %arg2: memref<2x1xi32, #tpu.memory_space<smem>>, %arg3: memref<2xi32, #tpu.memory_space<smem>>, %arg4: memref<128x256xbf16, #tpu.memory_space<vmem>>, %arg5: memref<256x128xbf16, #tpu.memory_space<vmem>>, %arg6: memref<128x128xbf16, #tpu.memory_space<vmem>>, %arg7: memref<128x128xf32, #tpu.memory_space<vmem>>) attributes {dimension_semantics = [#tpu.dimension_semantics<parallel>, #tpu.dimension_semantics<arbitrary>], iteration_bounds = array<i64: 2, 1>, scalar_prefetch = 2 : i64, scratch_operands = 0 : i64, tpu.core_type = #tpu.core_type<tc>, window_params = [{transform_indices = @transform_0, window_bounds = array<i64: 128, 256>}, {transform_indices = @transform_1, window_bounds = array<i64: 256, 128>}, {pipeline_mode = #tpu.pipeline_mode<synchronous>, transform_indices = @transform_2, window_bounds = array<i64: 128, 128>}, {transform_indices = @transform_3, window_bounds = array<i64: 128, 128>}]} {
    %c0_i32 = arith.constant 0 : i32
    %0 = arith.cmpi eq, %arg1, %c0_i32 : i32
    %1 = arith.extui %0 : i1 to i32
    %c0_i32_0 = arith.constant 0 : i32
    %2 = arith.cmpi ne, %1, %c0_i32_0 : i32
    scf.if %2 {
      %cst = arith.constant 0.000000e+00 : f32
      %8 = vector.broadcast %cst : f32 to vector<128x128xf32>
      %c0 = arith.constant 0 : index
      %c0_2 = arith.constant 0 : index
      %9 = vector.load %arg7[%c0, %c0_2] : memref<128x128xf32, #tpu.memory_space<vmem>>, vector<128x128xf32>
      tpu.vector_store %arg7[%c0, %c0_2], %8 {strides = array<i32>} : memref<128x128xf32, #tpu.memory_space<vmem>>, vector<128x128xf32>,
    } else {
    }
    %3 = arith.index_cast %arg0 : i32 to index
    %4 = memref.load %arg3[%3] : memref<2xi32, #tpu.memory_space<smem>>
    %5 = arith.cmpi slt, %arg1, %4 : i32
    %6 = arith.extui %5 : i1 to i32
    %c0_i32_1 = arith.constant 0 : i32
    %7 = arith.cmpi ne, %6, %c0_i32_1 : i32
    scf.if %7 {
      %c0 = arith.constant 0 : index
      %c0_2 = arith.constant 0 : index
      %8 = vector.load %arg5[%c0, %c0_2] : memref<256x128xbf16, #tpu.memory_space<vmem>>, vector<256x128xbf16>
      %c0_3 = arith.constant 0 : index
      %c0_4 = arith.constant 0 : index
      %9 = vector.load %arg6[%c0_3, %c0_4] : memref<128x128xbf16, #tpu.memory_space<vmem>>, vector<128x128xbf16>
      %cst = arith.constant dense<0.000000e+00> : vector<256x128xf32>
      %10 = tpu.matmul %8, %9, %cst {dimension_numbers = #tpu.dot_dimension_numbers<[1], [0], [0], [1], [0, 0, 1, 1], [], []>} : vector<256x128xbf16>, vector<128x128xbf16>, vector<256x128xf32> -> vector<256x128xf32>
      %11 = arith.truncf %10 : vector<256x128xf32> to vector<256x128xbf16>
      %c0_5 = arith.constant 0 : index
      %c0_6 = arith.constant 0 : index
      %12 = vector.load %arg7[%c0_5, %c0_6] : memref<128x128xf32, #tpu.memory_space<vmem>>, vector<128x128xf32>
      %c0_7 = arith.constant 0 : index
      %c0_8 = arith.constant 0 : index
      %13 = vector.load %arg4[%c0_7, %c0_8] : memref<128x256xbf16, #tpu.memory_space<vmem>>, vector<128x256xbf16>
      %cst_9 = arith.constant dense<0.000000e+00> : vector<128x128xf32>
      %14 = tpu.matmul %13, %11, %cst_9 {dimension_numbers = #tpu.dot_dimension_numbers<[1], [0], [0], [1], [0, 0, 1, 1], [], []>} : vector<128x256xbf16>, vector<256x128xbf16>, vector<128x128xf32> -> vector<128x128xf32>
      %15 = arith.addf %12, %14 : vector<128x128xf32>
      %c0_10 = arith.constant 0 : index
      %c0_11 = arith.constant 0 : index
      %16 = vector.load %arg7[%c0_10, %c0_11] : memref<128x128xf32, #tpu.memory_space<vmem>>, vector<128x128xf32>
      tpu.vector_store %arg7[%c0_10, %c0_11], %15 {strides = array<i32>} : memref<128x128xf32, #tpu.memory_space<vmem>>, vector<128x128xf32>,
    } else {
    }
    return
  }
  func.func @transform_0(%arg0: i32, %arg1: i32, %arg2: memref<2x1xi32, #tpu.memory_space<smem>>, %arg3: memref<2xi32, #tpu.memory_space<smem>>) -> (i32, i32) {
    %0 = arith.index_cast %arg0 : i32 to index
    %1 = arith.index_cast %arg1 : i32 to index
    %2 = memref.load %arg2[%0, %1] : memref<2x1xi32, #tpu.memory_space<smem>>
    %c0_i32 = arith.constant 0 : i32
    return %arg0, %2 : i32, i32
  }
  func.func @transform_1(%arg0: i32, %arg1: i32, %arg2: memref<2x1xi32, #tpu.memory_space<smem>>, %arg3: memref<2xi32, #tpu.memory_space<smem>>) -> (i32, i32) {
    %0 = arith.index_cast %arg0 : i32 to index
    %1 = arith.index_cast %arg1 : i32 to index
    %2 = memref.load %arg2[%0, %1] : memref<2x1xi32, #tpu.memory_space<smem>>
    %c0_i32 = arith.constant 0 : i32
    %c0_i32_0 = arith.constant 0 : i32
    return %2, %c0_i32 : i32, i32
  }
  func.func @transform_2(%arg0: i32, %arg1: i32, %arg2: memref<2x1xi32, #tpu.memory_space<smem>>, %arg3: memref<2xi32, #tpu.memory_space<smem>>) -> (i32, i32) {
    %c0_i32 = arith.constant 0 : i32
    %c0_i32_0 = arith.constant 0 : i32
    %c0_i32_1 = arith.constant 0 : i32
    return %c0_i32, %c0_i32_0 : i32, i32
  }
  func.func @transform_3(%arg0: i32, %arg1: i32, %arg2: memref<2x1xi32, #tpu.memory_space<smem>>, %arg3: memref<2xi32, #tpu.memory_space<smem>>) -> (i32, i32) {
    %c0_i32 = arith.constant 0 : i32
    %c0_i32_0 = arith.constant 0 : i32
    return %arg0, %c0_i32 : i32, i32
  }
}

</mosaic_0001>

<bundles_post_ra>
// kernel: _gcn_pallas.1
= control target key start
LH: loop header
LB: loop body
LE: loop exit
PB: predicated region body
PF: predicated region fallthrough
CT: control target
= control target key end

     0   :  { %s1788_s0 = inlined_call_operand.vmem [shape: s32[2,1], index: 0, kind: input, shape index: {}]   ;;  %s1789_s2 = inlined_call_operand.vmem [shape: bf16[256,256], index: 2, kind: input, shape index: {}]   ;;  %s1790_s3 = inlined_call_operand.vmem [shape: bf16[256,128], index: 3, kind: input, shape index: {}]   ;;  %s1791_s4 = inlined_call_operand.vmem [shape: bf16[128,128], index: 4, kind: input, shape index: {}]   ;;  %s1792_s5 = inlined_call_operand.hbm [shape: f32[256,128], index: 5, kind: output, shape index: {}]   ;;  %s1793_s1 = inlined_call_operand.vmem [shape: s32[2], index: 1, kind: input, shape index: {}]  }
   0x1   :  { %s10_s20 = sshll.u32 %s1788_s0, 4  ;;  %s14_s23 = sshll.u32 %s1793_s1, 4  ;;  %s11_s20 = int_to_ptr.vmem [resolvable:$true] %s10_s20  ;;  %s15_s23 = int_to_ptr.vmem [resolvable:$true] %s14_s23 }
   0x2   :  { %s1397_s24 = scalar_lea.vmem %s11_s20, 32  ;;  %p1402_p1 = scmp.lt.s32.totalorder %s11_s20, %s11_s20 }
   0x3   :  { %p1398_p0 = scmp.ne.s32.totalorder %s11_s20, %s1397_s24  ;;  %p1403_p2 = scmp.lt.s32.totalorder %s1397_s24, %s1397_s24 }
   0x5   :  { %p1404_p3 = por %p1403_p2, %p1402_p1 }
   0x7   :  { %p1405_p4 = pnand %p1404_p3, %p1398_p0 }
   0x9   :  { %1408 = shalt.err (!%p1405_p4)  }
   0xa   :  { %s1501_s25 = smov [#allocation3]   ;;  %s1409_s26 = scalar_lea.vmem %s15_s23, 16 }
   0xb   :  { %13 = dma.vmem_to_smem %s11_s20, 32, %s1501_s25, [#allocation2] }
   0xc   :  { %p1410_p5 = scmp.ne.s32.totalorder %s15_s23, %s1409_s26  ;;  %p1414_p6 = scmp.lt.s32.totalorder %s15_s23, %s15_s23 }
   0xd   :  { %p1415_p7 = scmp.lt.s32.totalorder %s1409_s26, %s1409_s26 }
   0xf   :  { %p1416_p8 = por %p1415_p7, %p1414_p6 }
  0x11   :  { %p1417_p9 = pnand %p1416_p8, %p1410_p5 }
  0x13   :  { %1420 = shalt.err (!%p1417_p9)  }
  0x14   :  { %s1502_s0 = smov [#allocation4]  }
  0x15   :  { %17 = dma.vmem_to_smem %s15_s23, 16, %s1502_s0, [#allocation2] }
  0x16   :  { %1471 = dma.done.wait [#allocation2], 48 }
  0x17   :  { %1472 = vsyncadd [#allocation2], 4294967248 }
  0x18   :  { %19 = sfence }
  0x19   :  { %20 = vsyncpa [#allocation6], 0 }
  0x1a   :  { %22 = vsyncpa [#allocation6 + $0x1], 0  ;;  %s1543_s1 = smov 0   ;;  %s1545_s27 = smov 0  }
  0x1b   :  { %s1547_s28 = smov 0   ;;  %s1549_s29 = smov 0  }
  0x1c   :  { %s1551_s30 = smov 0   ;;  %s1553_s6 = smov 0  }
  0x1d LB: > { %s1087_s7 = sadd.s32 4294967295, %s1499_s6   ;;  %s1088_s8 = sadd.s32 4294967294, %s1499_s6   ;;  %s1499_s6 = sphi %s1553_s6, %s28_s6   ;;  %s1495_s30 = sphi %s1551_s30, %s1803_s30   ;;  %s1491_s29 = sphi %s1549_s29, %s1802_s29   ;;  %s1487_s28 = sphi %s1547_s28, %s1801_s28   ;;  %s1483_s27 = sphi %s1545_s27, %s1800_s27   ;;  %s1479_s1 = sphi %s1543_s1, %s1799_s1  }
  0x1e   : > { %s40_s9 = sadd.s32 1, %s1495_s30  ;;  %s154_s10 = sadd.s32 1, %s1487_s28 }
  0x1f   : > { %p42_p10 = scmp.ge.s32.totalorder %s40_s9, 2  ;;  %p164_p11 = scmp.ne.s32.totalorder %s1487_s28, %s1483_s27 }
  0x20   : > { %p165_p12 = scmp.eq.s32.totalorder %s1087_s7, 1  ;;  %p170_p13 = scmp.ne.s32.totalorder %s1483_s27, %s1479_s1 }
  0x21   : > { %s1805_s9 = smov (%p42_p10, %s40_s9), 0  ;;  %p171_p1 = scmp.eq.s32.totalorder %s1088_s8, 1 }
  0x22   : > { %p1583_p0 = por %p165_p12, %p164_p11  ;;  %s151_s12 = ssub.s32 %s1495_s30, %s1805_s9 }
  0x23   : > { %p1095_p2 = scmp.ge.s32.totalorder %s1499_s6, 1  ;;  %p152_p3 = scmp.eq.s32.totalorder %s151_s12, 0 }
  0x24   : > { %p1590_p4 = por %p171_p1, %p170_p13  ;;  %p248_p5 = scmp.lt.s32.totalorder %s1499_s6, 3 }
  0x25   : > { %s1596_s14 = scalar_select %p152_p3, %s1487_s28, %s154_s10  }
  0x26   : > { %p249_p6 = pnand %p1095_p2, %p248_p5 }
  0x27   : > { %s1794_s15 = sand.u32 (!%p249_p6), 1, %s1483_s27   ;;  %s1097_s16 = sshll.u32 (!%p249_p6), %s1491_s29, 7 }
  0x28   : > { %252 = sbr.rel (%p249_p6) target bundleno = 664 (0x298), region = 32  ;;  %s1096_s17 = sshll.u32 (!%p249_p6), %s1794_s15, 7 }
  0x29   : > { %s305_s18 = sld [smem:[#allocation3 + %s1097_s16]] (!%p249_p6)  ;;  %s1098_s19 = sshll.u32 (!%p249_p6), %s1491_s29, 4 }
  0x2a   : > { %p1603_p7 = scmp.lt.s32.totalorder (!%p249_p6), %s1098_s19, 31  ;;  %s1607_s21 = sld [smem:[#allocation3 + %s1097_s16]] (!%p249_p6) }
  0x2b   : > { %s1609_s22 = scalar_lea.vmem (!%p249_p6), [#allocation5], %s1096_s17  ;;  %s370_s23 = sld [smem:[#allocation4 + %s1491_s29]] (!%p249_p6) }
  0x2d   : > { %v1503_v0 = vmov 0.0   ;;  %s1807_s19 = smov (!%p1603_p7, %s1098_s19), 31 }
  0x2e   : > { %354 = vst [vmem:[%s1609_s22] sm:$0xff] %v1503_v0  ;;  %355 = vst [vmem:[%s1609_s22 + $0x8] sm:$0xff] %v1503_v0  ;;  %s1100_s25 = sshll.u32 %s1807_s19, 1 }
  0x2f   : > { %356 = vst [vmem:[%s1609_s22 + $0x10] sm:$0xff] %v1503_v0  ;;  %357 = vst [vmem:[%s1609_s22 + $0x18] sm:$0xff] %v1503_v0  ;;  %s1099_s24 = sshll.u32 %s305_s18, 1 }
  0x30   : > { %358 = vst [vmem:[%s1609_s22 + $0x20] sm:$0xff] %v1503_v0  ;;  %359 = vst [vmem:[%s1609_s22 + $0x28] sm:$0xff] %v1503_v0  ;;  %p310_p8 = scmp.lt.s32.totalorder %s1099_s24, 1  ;;  %s1103_s26 = sshll.u32 %s1607_s21, 5 }
  0x31   : > { %360 = vst [vmem:[%s1609_s22 + $0x30] sm:$0xff] %v1503_v0  ;;  %361 = vst [vmem:[%s1609_s22 + $0x38] sm:$0xff] %v1503_v0  ;;  %p335_p9 = scmp.lt.s32.totalorder %s1103_s26, 31  ;;  %p1106_p10 = scmp.le.s32.totalorder %s370_s23, 0 }
  0x32   : > { %362 = vst [vmem:[%s1609_s22 + $0x40] sm:$0xff] %v1503_v0  ;;  %363 = vst [vmem:[%s1609_s22 + $0x48] sm:$0xff] %v1503_v0  ;;  %s1809_s24 = smov (!%p310_p8, %s1099_s24), 1 }
  0x33   : > { %364 = vst [vmem:[%s1609_s22 + $0x50] sm:$0xff] %v1503_v0  ;;  %365 = vst [vmem:[%s1609_s22 + $0x58] sm:$0xff] %v1503_v0  ;;  %s313_s0 = sadd.s32 %s1100_s25, %s1809_s24  ;;  %s1811_s26 = smov (!%p335_p9, %s1103_s26), 31 }
  0x34   : > { %366 = vst [vmem:[%s1609_s22 + $0x60] sm:$0xff] %v1503_v0  ;;  %367 = vst [vmem:[%s1609_s22 + $0x68] sm:$0xff] %v1503_v0  ;;  %s1101_s7 = sshll.u32 %s313_s0, 2  ;;  %s1104_s16 = sshll.u32 %s1811_s26, 2 }
  0x35   : > { %368 = vst [vmem:[%s1609_s22 + $0x70] sm:$0xff] %v1503_v0  ;;  %369 = vst [vmem:[%s1609_s22 + $0x78] sm:$0xff] %v1503_v0  ;;  %s1634_s12 = scalar_lea.vmem %s1789_s2, %s1101_s7  ;;  %s1639_s20 = scalar_lea.vmem %s1790_s3, %s1104_s16 }
  0x36   : > { %374 = sbr.rel (%p1106_p10) target bundleno = 639 (0x27f), region = 40 }
  0x3b   : > { %v1349_v1 = vld [vmem:[%s1791_s4 + $0x38] sm:$0xff]   ;;  %v1350_v2 = vld [vmem:[%s1791_s4 + $0x30] sm:$0xff]   ;;  %v1351_v3 = vld [vmem:[%s1791_s4 + $0x28] sm:$0xff]  }
  0x3c   : > { %1241 = vmatprep.subr.bf16.mxu0 %v1349_v1  ;;  %v1352_v4 = vld [vmem:[%s1791_s4 + $0x20] sm:$0xff]   ;;  %v1353_v6 = vld [vmem:[%s1791_s4 + $0x18] sm:$0xff]   ;;  %v1354_v7 = vld [vmem:[%s1791_s4 + $0x10] sm:$0xff]  }
  0x3d   : > { %1242 = vmatpush3.bf16.msra.mxu0 %v1349_v1  ;;  %v1357_v5 = vld [vmem:[%s1639_s20] sm:$0xff]   ;;  %v1355_v8 = vld [vmem:[%s1791_s4 + $0x8] sm:$0xff]   ;;  %v1359_v11 = vld [vmem:[%s1639_s20 + $0x10] sm:$0xff]  }
  0x3e   : > { %1243 = vmatprep.subr.bf16.mxu0 %v1350_v2  ;;  %1257 = vmatprep.mubr.bf16.mxu0 %v1357_v5  ;;  %v1356_v9 = vld [vmem:[%s1791_s4] sm:$0xff]   ;;  %v1358_v10 = vld [vmem:[%s1639_s20 + $0x8] sm:$0xff]   ;;  %v1360_v12 = vld [vmem:[%s1639_s20 + $0x18] sm:$0xff]  }
  0x3f   : > { %v1361_v13 = vld [vmem:[%s1639_s20 + $0x20] sm:$0xff]   ;;  %v1362_v14 = vld [vmem:[%s1639_s20 + $0x28] sm:$0xff]   ;;  %v1363_v15 = vld [vmem:[%s1639_s20 + $0x30] sm:$0xff]  }
  0x40   : > { %v1364_v16 = vld [vmem:[%s1639_s20 + $0x38] sm:$0xff]   ;;  %v1365_v17 = vld [vmem:[%s1639_s20 + $0x40] sm:$0xff]   ;;  %v1366_v18 = vld [vmem:[%s1639_s20 + $0x48] sm:$0xff]  }
  0x41   : > { %1244 = vmatpush3.bf16.msra.mxu0 %v1350_v2  ;;  %v1367_v19 = vld [vmem:[%s1639_s20 + $0x50] sm:$0xff]   ;;  %v1368_v20 = vld [vmem:[%s1639_s20 + $0x58] sm:$0xff]   ;;  %v1369_v21 = vld [vmem:[%s1639_s20 + $0x60] sm:$0xff]  }
  0x42   : > { %1245 = vmatprep.subr.bf16.mxu0 %v1351_v3  ;;  %v1370_v22 = vld [vmem:[%s1639_s20 + $0x68] sm:$0xff]   ;;  %v1371_v23 = vld [vmem:[%s1639_s20 + $0x70] sm:$0xff]   ;;  %v1372_v24 = vld [vmem:[%s1639_s20 + $0x78] sm:$0xff]  }
  0x43   : > { %v1375_v25 = vld [vmem:[%s1634_s12 + $0x4] ss:$8 sps:$4 sm:$0xff]  }
  0x44   : > { %888 = vmatprep.mubr.bf16.mxu1 %v1375_v25 }
  0x45   : > { %1246 = vmatpush3.bf16.msra.mxu0 %v1351_v3 }
  0x46   : > { %1247 = vmatprep.subr.bf16.mxu0 %v1352_v4 }
  0x49   : > { %1248 = vmatpush3.bf16.msra.mxu0 %v1352_v4 }
  0x4a   : > { %1249 = vmatprep.subr.bf16.mxu0 %v1353_v6 }
  0x4d   : > { %1250 = vmatpush3.bf16.msra.mxu0 %v1353_v6 }
  0x4e   : > { %1251 = vmatprep.subr.bf16.mxu0 %v1354_v7 }
  0x51   : > { %1252 = vmatpush3.bf16.msra.mxu0 %v1354_v7 }
  0x52   : > { %1253 = vmatprep.subr.bf16.mxu0 %v1355_v8 }
  0x55   : > { %1254 = vmatpush3.bf16.msra.mxu0 %v1355_v8 }
  0x56   : > { %1255 = vmatprep.subr.bf16.mxu0 %v1356_v9 }
  0x59   : > { %1256 = vmatpush3.bf16.msra.mxu0 %v1356_v9 }
  0x5c   : > { %1258 = vmatmul.mubr.bf16.vlgmr.msra.gmra.mxu0 %v1358_v10  ;;  %v1373_v10 = vld [vmem:[%s1634_s12] ss:$8 sps:$4 sm:$0xff]  }
  0x5d   : > { %1261 = vmatprep.mubr.bf16.mxu0 %v1359_v11  ;;  %v1376_v11 = vld [vmem:[%s1634_s12 + $0x14] ss:$8 sps:$4 sm:$0xff]  }
  0x64   : > { %1262 = vmatmul.mubr.bf16.gmra.mxu0 %v1360_v12  ;;  %v1378_v12 = vld [vmem:[%s1634_s12 + $0x10] ss:$8 sps:$4 sm:$0xff]  }
  0x65   : > { %1265 = vmatprep.mubr.bf16.mxu0 %v1361_v13  ;;  %v1379_v13 = vld [vmem:[%s1634_s12 + $0x24] ss:$8 sps:$4 sm:$0xff]  }
  0x6c   : > { %1266 = vmatmul.mubr.bf16.gmra.mxu0 %v1362_v14  ;;  %v1381_v14 = vld [vmem:[%s1634_s12 + $0x20] ss:$8 sps:$4 sm:$0xff]  }
  0x6d   : > { %1269 = vmatprep.mubr.bf16.mxu0 %v1363_v15  ;;  %v1382_v15 = vld [vmem:[%s1634_s12 + $0x34] ss:$8 sps:$4 sm:$0xff]  }
  0x74   : > { %1270 = vmatmul.mubr.bf16.gmra.mxu0 %v1364_v16  ;;  %v1384_v16 = vld [vmem:[%s1634_s12 + $0x30] ss:$8 sps:$4 sm:$0xff]  }
  0x75   : > { %1273 = vmatprep.mubr.bf16.mxu0 %v1365_v17  ;;  %v1385_v17 = vld [vmem:[%s1634_s12 + $0x44] ss:$8 sps:$4 sm:$0xff]  }
  0x7c   : > { %1274 = vmatmul.mubr.bf16.gmra.mxu0 %v1366_v18  ;;  %v1387_v18 = vld [vmem:[%s1634_s12 + $0x40] ss:$8 sps:$4 sm:$0xff]  }
  0x7d   : > { %1277 = vmatprep.mubr.bf16.mxu0 %v1367_v19  ;;  %v1388_v19 = vld [vmem:[%s1634_s12 + $0x54] ss:$8 sps:$4 sm:$0xff]  }
  0x84   : > { %1278 = vmatmul.mubr.bf16.gmra.mxu0 %v1368_v20  ;;  %v1390_v20 = vld [vmem:[%s1634_s12 + $0x50] ss:$8 sps:$4 sm:$0xff]  }
  0x85   : > { %1281 = vmatprep.mubr.bf16.mxu0 %v1369_v21  ;;  %v1391_v21 = vld [vmem:[%s1634_s12 + $0x64] ss:$8 sps:$4 sm:$0xff]  }
  0x8c   : > { %1282 = vmatmul.mubr.bf16.gmra.mxu0 %v1370_v22  ;;  %v1393_v22 = vld [vmem:[%s1634_s12 + $0x60] ss:$8 sps:$4 sm:$0xff]  }
  0x8d   : > { %1285 = vmatprep.mubr.bf16.mxu0 %v1371_v23  ;;  %v1394_v23 = vld [vmem:[%s1634_s12 + $0x74] ss:$8 sps:$4 sm:$0xff]  }
  0x94   : > { %1286 = vmatmul.mubr.bf16.gmra.mxu0 %v1372_v24  ;;  %v1396_v24 = vld [vmem:[%s1634_s12 + $0x70] ss:$8 sps:$4 sm:$0xff]  }
 0x11c   : > { %v1259_v26 = vpop.f32.mrf.mxu0 }
 0x11e   : > { %v1682_v27 = vpop.f32.mrf.mxu0 }
 0x120   : > { %v1260_v28 = vpop.f32.mrf.mxu0 }
 0x121   : > { %v729_v29 = vpack.c.bf16 %v1260_v28, %v1259_v26  ;;  %v744_v26 = vld [vmem:[%s1609_s22] sm:$0xff] }
 0x122   : > { %v604_v30 = vpop.f32.mrf.mxu0 }
 0x123   : > { %v728_v31 = vpack.c.bf16 %v604_v30, %v1682_v27 }
 0x124   : > { %v1263_v32 = vpop.f32.mrf.mxu0 }
 0x126   : > { %v617_v33 = vpop.f32.mrf.mxu0 }
 0x128   : > { %v1264_v34 = vpop.f32.mrf.mxu0 }
 0x129   : > { %v731_v35 = vpack.c.bf16 %v1264_v34, %v1263_v32 }
 0x12a   : > { %v620_v36 = vpop.f32.mrf.mxu0 }
 0x12b   : > { %v730_v37 = vpack.c.bf16 %v620_v36, %v617_v33  ;;  %v746_v36 = vld [vmem:[%s1609_s22 + $0x10] sm:$0xff] }
 0x12c   : > { %v1267_v38 = vpop.f32.mrf.mxu0 }
 0x12e   : > { %v633_v39 = vpop.f32.mrf.mxu0 }
 0x130   : > { %v1268_v40 = vpop.f32.mrf.mxu0 }
 0x131   : > { %v733_v3 = vpack.c.bf16 %v1268_v40, %v1267_v38 }
 0x132   : > { %v636_v41 = vpop.f32.mrf.mxu0 }
 0x133   : > { %v732_v5 = vpack.c.bf16 %v636_v41, %v633_v39  ;;  %v747_v41 = vld [vmem:[%s1609_s22 + $0x18] sm:$0xff] }
 0x134   : > { %v1271_v42 = vpop.f32.mrf.mxu0 }
 0x136   : > { %v649_v43 = vpop.f32.mrf.mxu0 }
 0x138   : > { %v1272_v44 = vpop.f32.mrf.mxu0 }
 0x139   : > { %v735_v62 = vpack.c.bf16 %v1272_v44, %v1271_v42 }
 0x13a   : > { %v652_v45 = vpop.f32.mrf.mxu0 }
 0x13b   : > { %v734_v1 = vpack.c.bf16 %v652_v45, %v649_v43 }
 0x13c   : > { %v1275_v46 = vpop.f32.mrf.mxu0 }
 0x13e   : > { %v665_v47 = vpop.f32.mrf.mxu0 }
 0x140   : > { %v1276_v48 = vpop.f32.mrf.mxu0 }
 0x141   : > { %v737_v8 = vpack.c.bf16 %v1276_v48, %v1275_v46  ;;  %v748_v46 = vld [vmem:[%s1609_s22 + $0x20] sm:$0xff] }
 0x142   : > { %v668_v49 = vpop.f32.mrf.mxu0 }
 0x143   : > { %v736_v9 = vpack.c.bf16 %v668_v49, %v665_v47 }
 0x144   : > { %v1279_v50 = vpop.f32.mrf.mxu0 }
 0x146   : > { %v681_v51 = vpop.f32.mrf.mxu0 }
 0x148   : > { %v1280_v52 = vpop.f32.mrf.mxu0 }
 0x149   : > { %v739_v6 = vpack.c.bf16 %v1280_v52, %v1279_v50 }
 0x14a   : > { %v684_v53 = vpop.f32.mrf.mxu0 }
 0x14b   : > { %v738_v7 = vpack.c.bf16 %v684_v53, %v681_v51  ;;  %v749_v51 = vld [vmem:[%s1609_s22 + $0x28] sm:$0xff] }
 0x14c   : > { %v1283_v54 = vpop.f32.mrf.mxu0 }
 0x14e   : > { %v697_v55 = vpop.f32.mrf.mxu0 }
 0x150   : > { %v1284_v56 = vpop.f32.mrf.mxu0 }
 0x151   : > { %v741_v2 = vpack.c.bf16 %v1284_v56, %v1283_v54  ;;  %v750_v56 = vld [vmem:[%s1609_s22 + $0x30] sm:$0xff] }
 0x152   : > { %v700_v57 = vpop.f32.mrf.mxu0 }
 0x153   : > { %v740_v4 = vpack.c.bf16 %v700_v57, %v697_v55 }
 0x154   : > { %v1287_v58 = vpop.f32.mrf.mxu0 }
 0x156   : > { %v713_v59 = vpop.f32.mrf.mxu0 }
 0x158   : > { %v1288_v60 = vpop.f32.mrf.mxu0 }
 0x159   : > { %v743_v61 = vpack.c.bf16 %v1288_v60, %v1287_v58 }
 0x15a   : > { %v716_v63 = vpop.f32.mrf.mxu0 }
 0x15b   : > { %v742_v0 = vpack.c.bf16 %v716_v63, %v713_v59  ;;  %1177 = vmatprep.subr.bf16.mxu1 %v743_v61  ;;  %v751_v61 = vld [vmem:[%s1609_s22 + $0x38] sm:$0xff] }
 0x15c   : > { %1178 = vmatpush3.bf16.msra.mxu1 %v735_v62 }
 0x15d   : > { %1179 = vmatprep.subr.bf16.mxu1 %v742_v0 }
 0x160   : > { %1180 = vmatpush3.bf16.msra.mxu1 %v734_v1 }
 0x161   : > { %1181 = vmatprep.subr.bf16.mxu1 %v741_v2  ;;  %v752_v2 = vld [vmem:[%s1609_s22 + $0x40] sm:$0xff] }
 0x164   : > { %1182 = vmatpush3.bf16.msra.mxu1 %v733_v3 }
 0x165   : > { %1183 = vmatprep.subr.bf16.mxu1 %v740_v4 }
 0x168   : > { %1184 = vmatpush3.bf16.msra.mxu1 %v732_v5 }
 0x169   : > { %1185 = vmatprep.subr.bf16.mxu1 %v739_v6 }
 0x16c   : > { %1186 = vmatpush3.bf16.msra.mxu1 %v731_v35 }
 0x16d   : > { %1187 = vmatprep.subr.bf16.mxu1 %v738_v7  ;;  %v753_v7 = vld [vmem:[%s1609_s22 + $0x48] sm:$0xff] }
 0x170   : > { %1188 = vmatpush3.bf16.msra.mxu1 %v730_v37 }
 0x171   : > { %1189 = vmatprep.subr.bf16.mxu1 %v737_v8 }
 0x174   : > { %1190 = vmatpush3.bf16.msra.mxu1 %v729_v29 }
 0x175   : > { %1191 = vmatprep.subr.bf16.mxu1 %v736_v9 }
 0x178   : > { %1192 = vmatpush3.bf16.msra.mxu1 %v728_v31  ;;  %v745_v31 = vld [vmem:[%s1609_s22 + $0x8] sm:$0xff] }
 0x17b   : > { %889 = vmatmul.mubr.bf16.vlgmr.msra.gmra.mxu1 %v1373_v10 }
 0x17c   : > { %896 = vmatprep.mubr.bf16.mxu1 %v1376_v11 }
 0x183   : > { %897 = vmatmul.mubr.bf16.gmra.mxu1 %v1378_v12  ;;  %v754_v12 = vld [vmem:[%s1609_s22 + $0x50] sm:$0xff] }
 0x184   : > { %904 = vmatprep.mubr.bf16.mxu1 %v1379_v13 }
 0x18b   : > { %905 = vmatmul.mubr.bf16.gmra.mxu1 %v1381_v14 }
 0x18c   : > { %912 = vmatprep.mubr.bf16.mxu1 %v1382_v15 }
 0x193   : > { %913 = vmatmul.mubr.bf16.gmra.mxu1 %v1384_v16 }
 0x194   : > { %920 = vmatprep.mubr.bf16.mxu1 %v1385_v17  ;;  %v755_v17 = vld [vmem:[%s1609_s22 + $0x58] sm:$0xff] }
 0x19b   : > { %921 = vmatmul.mubr.bf16.gmra.mxu1 %v1387_v18 }
 0x19c   : > { %928 = vmatprep.mubr.bf16.mxu1 %v1388_v19 }
 0x1a3   : > { %929 = vmatmul.mubr.bf16.gmra.mxu1 %v1390_v20 }
 0x1a4   : > { %936 = vmatprep.mubr.bf16.mxu1 %v1391_v21 }
 0x1ab   : > { %937 = vmatmul.mubr.bf16.gmra.mxu1 %v1393_v22  ;;  %v756_v22 = vld [vmem:[%s1609_s22 + $0x60] sm:$0xff] }
 0x1ac   : > { %944 = vmatprep.mubr.bf16.mxu1 %v1394_v23 }
 0x1b3   : > { %945 = vmatmul.mubr.bf16.gmra.mxu1 %v1396_v24 }
 0x23b   : > { %v1193_v25 = vpop.f32.mrf.mxu1 }
 0x23d   : > { %v1194_v27 = vpop.f32.mrf.mxu1 }
 0x23e   : > { %v1195_v28 = vadd.f32 %v1194_v27, %v1193_v25  ;;  %v757_v27 = vld [vmem:[%s1609_s22 + $0x68] sm:$0xff] }
 0x23f   : > { %v1196_v29 = vpop.f32.mrf.mxu1 }
 0x240   : > { %v953_v30 = vadd.f32 %v1195_v28, %v744_v26 }
 0x241   : > { %v1197_v32 = vpop.f32.mrf.mxu1 }
 0x242   : > { %969 = vst [vmem:[%s1609_s22] sm:$0xff] %v953_v30  ;;  %v1198_v33 = vadd.f32 %v1197_v32, %v1196_v29  ;;  %v758_v32 = vld [vmem:[%s1609_s22 + $0x70] sm:$0xff] }
 0x243   : > { %v1199_v34 = vpop.f32.mrf.mxu1 }
 0x244   : > { %v954_v35 = vadd.f32 %v1198_v33, %v745_v31 }
 0x245   : > { %v1200_v37 = vpop.f32.mrf.mxu1 }
 0x246   : > { %970 = vst [vmem:[%s1609_s22 + $0x8] sm:$0xff] %v954_v35  ;;  %v1201_v38 = vadd.f32 %v1200_v37, %v1199_v34  ;;  %v759_v37 = vld [vmem:[%s1609_s22 + $0x78] sm:$0xff] }
 0x247   : > { %v1202_v39 = vpop.f32.mrf.mxu1 }
 0x248   : > { %v955_v40 = vadd.f32 %v1201_v38, %v746_v36 }
 0x249   : > { %v1203_v42 = vpop.f32.mrf.mxu1 }
 0x24a   : > { %971 = vst [vmem:[%s1609_s22 + $0x10] sm:$0xff] %v955_v40  ;;  %v1204_v43 = vadd.f32 %v1203_v42, %v1202_v39 }
 0x24b   : > { %v1205_v44 = vpop.f32.mrf.mxu1 }
 0x24c   : > { %v956_v45 = vadd.f32 %v1204_v43, %v747_v41 }
 0x24d   : > { %v1206_v47 = vpop.f32.mrf.mxu1 }
 0x24e   : > { %972 = vst [vmem:[%s1609_s22 + $0x18] sm:$0xff] %v956_v45  ;;  %v1207_v48 = vadd.f32 %v1206_v47, %v1205_v44 }
 0x24f   : > { %v1208_v49 = vpop.f32.mrf.mxu1 }
 0x250   : > { %v957_v50 = vadd.f32 %v1207_v48, %v748_v46 }
 0x251   : > { %v1209_v52 = vpop.f32.mrf.mxu1 }
 0x252   : > { %973 = vst [vmem:[%s1609_s22 + $0x20] sm:$0xff] %v957_v50  ;;  %v1210_v53 = vadd.f32 %v1209_v52, %v1208_v49 }
 0x253   : > { %v1211_v54 = vpop.f32.mrf.mxu1 }
 0x254   : > { %v958_v55 = vadd.f32 %v1210_v53, %v749_v51 }
 0x255   : > { %v1212_v57 = vpop.f32.mrf.mxu1 }
 0x256   : > { %974 = vst [vmem:[%s1609_s22 + $0x28] sm:$0xff] %v958_v55  ;;  %v1213_v58 = vadd.f32 %v1212_v57, %v1211_v54 }
 0x257   : > { %v1214_v59 = vpop.f32.mrf.mxu1 }
 0x258   : > { %v959_v60 = vadd.f32 %v1213_v58, %v750_v56 }
 0x259   : > { %v1215_v62 = vpop.f32.mrf.mxu1 }
 0x25a   : > { %975 = vst [vmem:[%s1609_s22 + $0x30] sm:$0xff] %v959_v60  ;;  %v1216_v63 = vadd.f32 %v1215_v62, %v1214_v59 }
 0x25b   : > { %v1217_v0 = vpop.f32.mrf.mxu1 }
 0x25c   : > { %v960_v1 = vadd.f32 %v1216_v63, %v751_v61 }
 0x25d   : > { %v1218_v3 = vpop.f32.mrf.mxu1 }
 0x25e   : > { %976 = vst [vmem:[%s1609_s22 + $0x38] sm:$0xff] %v960_v1  ;;  %v1219_v4 = vadd.f32 %v1218_v3, %v1217_v0 }
 0x25f   : > { %v1220_v5 = vpop.f32.mrf.mxu1 }
 0x260   : > { %v961_v6 = vadd.f32 %v1219_v4, %v752_v2 }
 0x261   : > { %v1221_v8 = vpop.f32.mrf.mxu1 }
 0x262   : > { %977 = vst [vmem:[%s1609_s22 + $0x40] sm:$0xff] %v961_v6  ;;  %v1222_v9 = vadd.f32 %v1221_v8, %v1220_v5 }
 0x263   : > { %v1223_v10 = vpop.f32.mrf.mxu1 }
 0x264   : > { %v962_v11 = vadd.f32 %v1222_v9, %v753_v7 }
 0x265   : > { %v1224_v13 = vpop.f32.mrf.mxu1 }
 0x266   : > { %978 = vst [vmem:[%s1609_s22 + $0x48] sm:$0xff] %v962_v11  ;;  %v1225_v14 = vadd.f32 %v1224_v13, %v1223_v10 }
 0x267   : > { %v1226_v15 = vpop.f32.mrf.mxu1 }
 0x268   : > { %v963_v16 = vadd.f32 %v1225_v14, %v754_v12 }
 0x269   : > { %v1227_v18 = vpop.f32.mrf.mxu1 }
 0x26a   : > { %979 = vst [vmem:[%s1609_s22 + $0x50] sm:$0xff] %v963_v16  ;;  %v1228_v19 = vadd.f32 %v1227_v18, %v1226_v15 }
 0x26b   : > { %v1229_v20 = vpop.f32.mrf.mxu1 }
 0x26c   : > { %v964_v21 = vadd.f32 %v1228_v19, %v755_v17 }
 0x26d   : > { %v1230_v23 = vpop.f32.mrf.mxu1 }
 0x26e   : > { %980 = vst [vmem:[%s1609_s22 + $0x58] sm:$0xff] %v964_v21  ;;  %v1231_v24 = vadd.f32 %v1230_v23, %v1229_v20 }
 0x26f   : > { %v1232_v25 = vpop.f32.mrf.mxu1 }
 0x270   : > { %v965_v26 = vadd.f32 %v1231_v24, %v756_v22 }
 0x271   : > { %v1233_v28 = vpop.f32.mrf.mxu1 }
 0x272   : > { %981 = vst [vmem:[%s1609_s22 + $0x60] sm:$0xff] %v965_v26  ;;  %v1234_v29 = vadd.f32 %v1233_v28, %v1232_v25 }
 0x273   : > { %v1235_v30 = vpop.f32.mrf.mxu1 }
 0x274   : > { %v966_v31 = vadd.f32 %v1234_v29, %v757_v27 }
 0x275   : > { %v1236_v33 = vpop.f32.mrf.mxu1 }
 0x276   : > { %982 = vst [vmem:[%s1609_s22 + $0x68] sm:$0xff] %v966_v31  ;;  %v1237_v34 = vadd.f32 %v1236_v33, %v1235_v30 }
 0x277   : > { %v1238_v35 = vpop.f32.mrf.mxu1 }
 0x278   : > { %v967_v36 = vadd.f32 %v1237_v34, %v758_v32 }
 0x279   : > { %v1239_v38 = vpop.f32.mrf.mxu1 }
 0x27a   : > { %983 = vst [vmem:[%s1609_s22 + $0x70] sm:$0xff] %v967_v36  ;;  %v1240_v39 = vadd.f32 %v1239_v38, %v1238_v35 }
 0x27c   : > { %v968_v40 = vadd.f32 %v1240_v39, %v759_v37 }
 0x27e   : > { %984 = vst [vmem:[%s1609_s22 + $0x78] sm:$0xff] %v968_v40 }
 0x27f PF: > { %s1152_s12 = sshll.u32 %s1491_s29, 11  ;;  %s999_s25 = sshll.u32 %s1609_s22, 4  ;;  %s1739_s25 = int_to_ptr.vmem [resolvable:$true] %s999_s25 }
 0x280   : > { %s1736_s24 = scalar_lea.hbm %s1792_s5, %s1152_s12  ;;  %s1798_s26 = sand.u32 1, %s1483_s27  }
 0x281   : > { %s1743_s15 = scalar_lea.sflag [#allocation6], %s1798_s26  ;;  %s1421_s23 = scalar_lea.vmem %s1739_s25, 2048 }
 0x282   : > { %p1422_p11 = scmp.ne.s32.totalorder %s1739_s25, %s1421_s23  ;;  %s1504_s29 = smov [#allocation5]  }
 0x283   : > { %s1425_s0 = sshll.u32 %s1504_s29, 4  ;;  %s1426_s0 = int_to_ptr.vmem [resolvable:$false] %s1425_s0 }
 0x284   : > { %p1423_p12 = pnand %p1422_p11, %p1583_p0  ;;  %s1427_s7 = scalar_lea.vmem %s1426_s0, 4096 }
 0x285   : > { %p1428_p1 = scmp.lt.s32.totalorder %s1739_s25, %s1426_s0  ;;  %p1429_p2 = scmp.lt.s32.totalorder %s1427_s7, %s1421_s23 }
 0x286   : > { %p1424_p13 = pneg %p1423_p12 }
 0x287   : > { %p1430_p3 = por %p1429_p2, %p1428_p1 }
 0x289   : > { %p1431_p5 = pnand %p1430_p3, %p1424_p13 }
 0x28b   : > { %1434 = shalt.err (!%p1431_p5)
}
 0x28c   : > { %s1435_s22 = scalar_lea.hbm %s1736_s24, 2048  ;;  %s1439_s16 = scalar_lea.hbm %s1792_s5, 4096 }
 0x28d   : > { %p1436_p6 = scmp.ne.s32.totalorder %s1736_s24, %s1435_s22  ;;  %p1440_p9 = scmp.lt.s32.totalorder %s1736_s24, %s1792_s5 }
 0x28e   : > { %p1441_p10 = scmp.lt.s32.totalorder %s1439_s16, %s1435_s22 }
 0x28f   : > { %p1437_p7 = pnand %p1436_p6, %p1583_p0 }
 0x290   : > { %p1442_p11 = por %p1441_p10, %p1440_p9 }
 0x291   : > { %p1438_p8 = pneg %p1437_p7 }
 0x293   : > { %p1443_p12 = pnand %p1442_p11, %p1438_p8 }
 0x295   : > { %1446 = shalt.err (!%p1443_p12)
}
 0x296   : > { %s1505_s19 = smov 128   ;;  %s1506_s12 = smov 8  }
 0x297   : > { %1289 = dma.vmem_to_hbm [thread:$0]  (%p1583_p0), %s1739_s25, 2048, %s1736_s24, %s1743_s15, %s1505_s19, %s1505_s19, %s1506_s12  }
 0x298 PF: > { %p1295_p13 = scmp.ge.s32.totalorder %s1499_s6, 2  ;;  %s1014_s20 = sand.u32 1, %s1479_s1  }
 0x299   : > { %s1015_s21 = scalar_lea.sflag [#allocation6], %s1014_s20 }
 0x29a   : > { %p1292_p1 = pnand %p1295_p13, %p1590_p4 }
 0x29c   : > { %p1293_p2 = pneg %p1292_p1 }
 0x29e   : > { %1474 = dma.done.wait (%p1293_p2), %s1015_s21, 2048  }
 0x29f   : > { %1476 = vsyncadd (%p1293_p2), %s1015_s21, 4294965248  ;;  %s28_s6 = sadd.s32 1, %s1499_s6   ;;  %s1799_s1 = smov %s1483_s27 }
 0x2a0   : > { %p25_p3 = scmp.ge.s32.totalorder %s28_s6, 4   ;;  %s1800_s27 = smov %s1487_s28 }
 0x2a1   : > { %s1801_s28 = smov %s1596_s14  ;;  %s1802_s29 = smov %s1495_s30 }
 0x2a2   : > { %s1803_s30 = smov %s1805_s9  ;;  %27 = sbr.rel (!%p25_p3) target bundleno = 29 (0x1d), region = 78 }
 0x2a7   :  { %1020 = vsyncpa [#allocation6], 1 }
 0x2a8   :  { %1022 = vsyncpa [#allocation6 + $0x1], 1 }

</bundles_post_ra>
